<compile_context>
chip_gen: v6e
topology: v6e:2x2x1
jax: 0.10.0
libtpu: 0.0.40
codegen_flags: <defaults>
</compile_context>

<pallas_src>
import jax
import jax.numpy as jnp
from jax.experimental import pallas as pl
from jax.experimental.pallas import tpu as pltpu

_EPS = 1e-5
_COUT1 = 32
_COUT2 = 64
_COUT2_PAD = 128  # lane-dense padded output channels


# ---------------------------------------------------------------------------
# Fused Pallas kernel: conv1 + BN + ReLU + MaxPool(2) + conv2 + BN + ReLU
# ---------------------------------------------------------------------------
def _encoder_kernel(x_ref, w1_ref, b1_ref, w2_ref, b2_ref, o_ref, ypad_ref):
    """One batch element per grid step.

    x_ref    : (2, Lp+2, Cin)  [even rows ; odd rows] of the zero-padded input sequence
    w1_ref   : (5, Cin, 32)    conv1 taps, BN scale folded in
    b1_ref   : (1, 32)         conv1 bias + BN shift
    w2_ref   : (3, 32, 128)    conv2 taps (out channels zero-padded to 128), BN scale folded
    b2_ref   : (1, 128)        conv2 bias + BN shift (zero-padded)
    o_ref    : (Lp, 128)       output (lane-dense)
    ypad_ref : (Lp+2, 32)      VMEM scratch: zero-padded pooled conv1 activations
    """
    Lp = o_ref.shape[0]
    f32 = jnp.float32

    xe = x_ref[0]  # (Lp+2, Cin) even-position rows
    xo = x_ref[1]  # (Lp+2, Cin) odd-position rows

    # conv1 (k=5, pad=2) via polyphase decomposition:
    #   y1[2j]   = xe[j]@w0 + xo[j]@w1 + xe[j+1]@w2 + xo[j+1]@w3 + xe[j+2]@w4
    #   y1[2j+1] = xo[j]@w0 + xe[j+1]@w1 + xo[j+1]@w2 + xe[j+2]@w3 + xo[j+2]@w4
    acc_e = (jnp.dot(xe[0:Lp], w1_ref[0], preferred_element_type=f32)
             + jnp.dot(xo[0:Lp], w1_ref[1], preferred_element_type=f32)
             + jnp.dot(xe[1:Lp + 1], w1_ref[2], preferred_element_type=f32)
             + jnp.dot(xo[1:Lp + 1], w1_ref[3], preferred_element_type=f32)
             + jnp.dot(xe[2:Lp + 2], w1_ref[4], preferred_element_type=f32))
    acc_o = (jnp.dot(xo[0:Lp], w1_ref[0], preferred_element_type=f32)
             + jnp.dot(xe[1:Lp + 1], w1_ref[1], preferred_element_type=f32)
             + jnp.dot(xo[1:Lp + 1], w1_ref[2], preferred_element_type=f32)
             + jnp.dot(xe[2:Lp + 2], w1_ref[3], preferred_element_type=f32)
             + jnp.dot(xo[2:Lp + 2], w1_ref[4], preferred_element_type=f32))

    # MaxPool1d(2) + BN shift + ReLU.  relu(max(a,b)+s) == max(relu(a+s), relu(b+s)) for scale>0.
    pooled = jnp.maximum(jnp.maximum(acc_e, acc_o) + b1_ref[...], 0.0)  # (Lp, 32)

    # Zero-padded pooled activations for conv2 (k=3, pad=1); stays entirely in VMEM.
    zrow = jnp.zeros((1, _COUT1), f32)
    ypad_ref[pl.ds(0, 1), :] = zrow
    ypad_ref[pl.ds(Lp + 1, 1), :] = zrow
    ypad_ref[pl.ds(1, Lp), :] = pooled

    acc2 = (jnp.dot(ypad_ref[pl.ds(0, Lp), :], w2_ref[0], preferred_element_type=f32)
            + jnp.dot(ypad_ref[pl.ds(1, Lp), :], w2_ref[1], preferred_element_type=f32)
            + jnp.dot(ypad_ref[pl.ds(2, Lp), :], w2_ref[2], preferred_element_type=f32))
    o_ref[...] = jnp.maximum(acc2 + b2_ref[...], 0.0)  # (Lp, 128), lane-dense store


# ---------------------------------------------------------------------------
# pallas_call wrapper
# ---------------------------------------------------------------------------
def _encoder_pallas(x_eo, w1, b1, w2, b2):
    B, _, Lp2, Cin = x_eo.shape
    Lp = Lp2 - 2
    Cout_p = w2.shape[2]

    flops = int(B * (2 * (2 * Lp) * (Cin * 5) * _COUT1 + 2 * Lp * (_COUT1 * 3) * Cout_p))
    bytes_accessed = int(4 * (x_eo.size + w1.size + b1.size
                              + w2.size + b2.size + B * Lp * Cout_p))

    return pl.pallas_call(
        _encoder_kernel,
        out_shape=jax.ShapeDtypeStruct((B, Lp, Cout_p), jnp.float32),
        grid_spec=pltpu.PrefetchScalarGridSpec(
            num_scalar_prefetch=0,
            grid=(B,),
            in_specs=[
                # One packed DMA per grid step (even + odd phases together).
                pl.BlockSpec((None, 2, Lp + 2, Cin), lambda b: (b, 0, 0, 0)),
                # Weights / biases: constant index_map -> resident across the grid.
                pl.BlockSpec((5, Cin, _COUT1), lambda b: (0, 0, 0)),
                pl.BlockSpec((1, _COUT1), lambda b: (0, 0)),
                pl.BlockSpec((3, _COUT1, Cout_p), lambda b: (0, 0, 0)),
                pl.BlockSpec((1, Cout_p), lambda b: (0, 0)),
            ],
            out_specs=pl.BlockSpec((None, Lp, Cout_p), lambda b: (b, 0, 0)),
            scratch_shapes=[pltpu.VMEM((Lp + 2, _COUT1), jnp.float32)],
        ),
        compiler_params=pltpu.CompilerParams(dimension_semantics=("parallel",)),
        cost_estimate=pl.CostEstimate(flops=flops, transcendentals=0,
                                      bytes_accessed=bytes_accessed),
    )(x_eo, w1, b1, w2, b2)


# ---------------------------------------------------------------------------
# Plain-JAX glue: parameter folding + forward pass
# ---------------------------------------------------------------------------
def _fold_bn(conv_bias, gamma, beta, mean, var):
    scale = gamma / jnp.sqrt(var + _EPS)
    shift = beta + (conv_bias - mean) * scale
    return scale, shift


def init_params(key, d_size):
    ks = jax.random.split(key, 12)
    # conv1: Conv1d(d_size, 32, 5, 1, 2) + BatchNorm1d(32)
    w1_t = 0.1 * jax.random.normal(ks[0], (_COUT1, d_size, 5), jnp.float32)
    b1 = 0.1 * jax.random.normal(ks[1], (_COUT1,), jnp.float32)
    g1 = 1.0 + 0.1 * jax.random.normal(ks[2], (_COUT1,), jnp.float32)
    be1 = 0.1 * jax.random.normal(ks[3], (_COUT1,), jnp.float32)
    m1 = 0.1 * jax.random.normal(ks[4], (_COUT1,), jnp.float32)
    v1 = jax.random.uniform(ks[5], (_COUT1,), jnp.float32, 0.5, 1.5)
    # conv2: Conv1d(32, 64, 3, 1, 1) + BatchNorm1d(64)
    w2_t = 0.1 * jax.random.normal(ks[6], (_COUT2, _COUT1, 3), jnp.float32)
    b2 = 0.1 * jax.random.normal(ks[7], (_COUT2,), jnp.float32)
    g2 = 1.0 + 0.1 * jax.random.normal(ks[8], (_COUT2,), jnp.float32)
    be2 = 0.1 * jax.random.normal(ks[9], (_COUT2,), jnp.float32)
    m2 = 0.1 * jax.random.normal(ks[10], (_COUT2,), jnp.float32)
    v2 = jax.random.uniform(ks[11], (_COUT2,), jnp.float32, 0.5, 1.5)

    raw = dict(w1_t=w1_t, b1=b1, g1=g1, be1=be1, m1=m1, v1=v1,
               w2_t=w2_t, b2=b2, g2=g2, be2=be2, m2=m2, v2=v2)

    s1, t1 = _fold_bn(b1, g1, be1, m1, v1)           # (32,)
    s2, t2 = _fold_bn(b2, g2, be2, m2, v2)           # (64,)

    # Fold BN scale directly into the conv weights; store per-tap (K, Cin, Cout) layouts.
    w1 = jnp.transpose(w1_t, (2, 1, 0)) * s1[None, None, :]          # (5, Cin, 32)
    w2 = jnp.transpose(w2_t, (2, 1, 0)) * s2[None, None, :]          # (3, 32, 64)
    w2 = jnp.pad(w2, ((0, 0), (0, 0), (0, _COUT2_PAD - _COUT2)))     # (3, 32, 128) lane-dense
    b2p = jnp.pad(t2, (0, _COUT2_PAD - _COUT2))                      # (128,)

    params = dict(
        w1=w1, b1=t1.reshape(1, _COUT1),
        w2=w2, b2=b2p.reshape(1, _COUT2_PAD),
    )
    return raw, params


def conv1d_encoder_forward(x_ncl, params):
    """x_ncl: (B, d_size, L) float32 -> (B, 64, L // 2) float32 (matches PyTorch forward)."""
    B, Cin, L = x_ncl.shape
    assert L % 2 == 0, "MaxPool1d(2) path implemented for even L"
    Lp = L // 2

    x = jnp.transpose(x_ncl, (0, 2, 1))                  # (B, L, Cin)
    x_pad = jnp.pad(x, ((0, 0), (2, 2), (0, 0)))         # (B, L+4, Cin)
    # Polyphase split of the (small, Cin-wide) padded input so every in-kernel slice is a
    # contiguous static slice; pack even/odd phases into one array -> one DMA per grid step.
    xe = x_pad[:, 0::2, :]                               # (B, Lp+2, Cin)
    xo = x_pad[:, 1::2, :]                               # (B, Lp+2, Cin)
    x_eo = jnp.stack([xe, xo], axis=1)                   # (B, 2, Lp+2, Cin)

    y = _encoder_pallas(x_eo, params["w1"], params["b1"], params["w2"], params["b2"])
    y = y[:, :, :_COUT2]                                 # drop lane-padding channels
    return jnp.transpose(y, (0, 2, 1))                   # NCL: (B, 64, L//2)


# ---------------------------------------------------------------------------
# Pure-JAX reference (for validation)
# ---------------------------------------------------------------------------
def reference_forward(x_ncl, raw):
    def conv1d(x, w, b, pad):
        y = jax.lax.conv_general_dilated(
            x, w, window_strides=(1,), padding=[(pad, pad)],
            dimension_numbers=("NCW", "OIW", "NCW"))
        return y + b[None, :, None]

    def bn(x, g, be, m, v):
        return (x - m[None, :, None]) / jnp.sqrt(v[None, :, None] + _EPS) * g[None, :, None] \
               + be[None, :, None]

    y = jax.nn.relu(bn(conv1d(x_ncl, raw["w1_t"], raw["b1"], 2),
                       raw["g1"], raw["be1"], raw["m1"], raw["v1"]))
    B, C, L = y.shape
    y = y.reshape(B, C, L // 2, 2).max(axis=-1)          # MaxPool1d(2)
    y = jax.nn.relu(bn(conv1d(y, raw["w2_t"], raw["b2"], 1),
                       raw["g2"], raw["be2"], raw["m2"], raw["v2"]))
    return y


if __name__ == "__main__":
    key = jax.random.PRNGKey(0)
    k_x, k_p = jax.random.split(key)

    d_size, B, L = 4, 2, 16
    x = jax.random.normal(k_x, (B, d_size, L), jnp.float32)
    raw, params = init_params(k_p, d_size)

    out = conv1d_encoder_forward(x, params)
    out = jax.block_until_ready(out)

    ref = reference_forward(x, raw)
    assert out.shape == (B, 64, L // 2), out.shape
    if not jnp.allclose(out, ref, atol=1e-4, rtol=1e-4):
        max_err = float(jnp.max(jnp.abs(out - ref)))
        raise AssertionError(f"Pallas kernel mismatch vs reference, max abs err = {max_err}")
    print("KERNEL_OK")
</pallas_src>

<mosaic_0001>
module attributes {stable_mosaic.version = 11 : i64} {
  func.func @_encoder_kernel(%arg0: i32, %arg1: memref<1x2x10x4xf32, #tpu.memory_space<vmem>>, %arg2: memref<5x4x32xf32, #tpu.memory_space<vmem>>, %arg3: memref<1x32xf32, #tpu.memory_space<vmem>>, %arg4: memref<3x32x128xf32, #tpu.memory_space<vmem>>, %arg5: memref<1x128xf32, #tpu.memory_space<vmem>>, %arg6: memref<1x8x128xf32, #tpu.memory_space<vmem>>, %arg7: memref<10x32xf32, #tpu.memory_space<vmem>>) attributes {dimension_semantics = [#tpu.dimension_semantics<parallel>], iteration_bounds = array<i64: 2>, scalar_prefetch = 0 : i64, scratch_operands = 1 : i64, tpu.core_type = #tpu.core_type<tc>, window_params = [{transform_indices = @transform_0, window_bounds = array<i64: 1, 2, 10, 4>}, {pipeline_mode = #tpu.pipeline_mode<synchronous>, transform_indices = @transform_1, window_bounds = array<i64: 5, 4, 32>}, {pipeline_mode = #tpu.pipeline_mode<synchronous>, transform_indices = @transform_2, window_bounds = array<i64: 1, 32>}, {pipeline_mode = #tpu.pipeline_mode<synchronous>, transform_indices = @transform_3, window_bounds = array<i64: 3, 32, 128>}, {pipeline_mode = #tpu.pipeline_mode<synchronous>, transform_indices = @transform_4, window_bounds = array<i64: 1, 128>}, {transform_indices = @transform_5, window_bounds = array<i64: 1, 8, 128>}]} {
    %c0 = arith.constant 0 : index
    %c0_0 = arith.constant 0 : index
    %c0_1 = arith.constant 0 : index
    %c0_2 = arith.constant 0 : index
    %0 = vector.load %arg1[%c0, %c0_0, %c0_1, %c0_2] : memref<1x2x10x4xf32, #tpu.memory_space<vmem>>, vector<1x1x10x4xf32>
    %1 = vector.shape_cast %0 : vector<1x1x10x4xf32> to vector<10x4xf32>
    %c0_3 = arith.constant 0 : index
    %c1 = arith.constant 1 : index
    %c0_4 = arith.constant 0 : index
    %c0_5 = arith.constant 0 : index
    %2 = vector.load %arg1[%c0_3, %c1, %c0_4, %c0_5] : memref<1x2x10x4xf32, #tpu.memory_space<vmem>>, vector<1x1x10x4xf32>
    %3 = vector.shape_cast %2 : vector<1x1x10x4xf32> to vector<10x4xf32>
    %4 = vector.extract_strided_slice %1 {offsets = [0, 0], sizes = [8, 4], strides = [1, 1]} : vector<10x4xf32> to vector<8x4xf32>
    %c0_6 = arith.constant 0 : index
    %c0_7 = arith.constant 0 : index
    %c0_8 = arith.constant 0 : index
    %5 = vector.load %arg2[%c0_6, %c0_7, %c0_8] : memref<5x4x32xf32, #tpu.memory_space<vmem>>, vector<1x4x32xf32>
    %6 = vector.shape_cast %5 : vector<1x4x32xf32> to vector<4x32xf32>
    %cst = arith.constant dense<0.000000e+00> : vector<8x32xf32>
    %7 = tpu.matmul %4, %6, %cst {dimension_numbers = #tpu.dot_dimension_numbers<[1], [0], [0], [1], [0, 0, 1, 1], [], []>} : vector<8x4xf32>, vector<4x32xf32>, vector<8x32xf32> -> vector<8x32xf32>
    %8 = vector.extract_strided_slice %3 {offsets = [0, 0], sizes = [8, 4], strides = [1, 1]} : vector<10x4xf32> to vector<8x4xf32>
    %c1_9 = arith.constant 1 : index
    %c0_10 = arith.constant 0 : index
    %c0_11 = arith.constant 0 : index
    %9 = vector.load %arg2[%c1_9, %c0_10, %c0_11] : memref<5x4x32xf32, #tpu.memory_space<vmem>>, vector<1x4x32xf32>
    %10 = vector.shape_cast %9 : vector<1x4x32xf32> to vector<4x32xf32>
    %cst_12 = arith.constant dense<0.000000e+00> : vector<8x32xf32>
    %11 = tpu.matmul %8, %10, %cst_12 {dimension_numbers = #tpu.dot_dimension_numbers<[1], [0], [0], [1], [0, 0, 1, 1], [], []>} : vector<8x4xf32>, vector<4x32xf32>, vector<8x32xf32> -> vector<8x32xf32>
    %12 = arith.addf %7, %11 : vector<8x32xf32>
    %13 = vector.extract_strided_slice %1 {offsets = [1, 0], sizes = [8, 4], strides = [1, 1]} : vector<10x4xf32> to vector<8x4xf32>
    %c2 = arith.constant 2 : index
    %c0_13 = arith.constant 0 : index
    %c0_14 = arith.constant 0 : index
    %14 = vector.load %arg2[%c2, %c0_13, %c0_14] : memref<5x4x32xf32, #tpu.memory_space<vmem>>, vector<1x4x32xf32>
    %15 = vector.shape_cast %14 : vector<1x4x32xf32> to vector<4x32xf32>
    %cst_15 = arith.constant dense<0.000000e+00> : vector<8x32xf32>
    %16 = tpu.matmul %13, %15, %cst_15 {dimension_numbers = #tpu.dot_dimension_numbers<[1], [0], [0], [1], [0, 0, 1, 1], [], []>} : vector<8x4xf32>, vector<4x32xf32>, vector<8x32xf32> -> vector<8x32xf32>
    %17 = arith.addf %12, %16 : vector<8x32xf32>
    %18 = vector.extract_strided_slice %3 {offsets = [1, 0], sizes = [8, 4], strides = [1, 1]} : vector<10x4xf32> to vector<8x4xf32>
    %c3 = arith.constant 3 : index
    %c0_16 = arith.constant 0 : index
    %c0_17 = arith.constant 0 : index
    %19 = vector.load %arg2[%c3, %c0_16, %c0_17] : memref<5x4x32xf32, #tpu.memory_space<vmem>>, vector<1x4x32xf32>
    %20 = vector.shape_cast %19 : vector<1x4x32xf32> to vector<4x32xf32>
    %cst_18 = arith.constant dense<0.000000e+00> : vector<8x32xf32>
    %21 = tpu.matmul %18, %20, %cst_18 {dimension_numbers = #tpu.dot_dimension_numbers<[1], [0], [0], [1], [0, 0, 1, 1], [], []>} : vector<8x4xf32>, vector<4x32xf32>, vector<8x32xf32> -> vector<8x32xf32>
    %22 = arith.addf %17, %21 : vector<8x32xf32>
    %23 = vector.extract_strided_slice %1 {offsets = [2, 0], sizes = [8, 4], strides = [1, 1]} : vector<10x4xf32> to vector<8x4xf32>
    %c4 = arith.constant 4 : index
    %c0_19 = arith.constant 0 : index
    %c0_20 = arith.constant 0 : index
    %24 = vector.load %arg2[%c4, %c0_19, %c0_20] : memref<5x4x32xf32, #tpu.memory_space<vmem>>, vector<1x4x32xf32>
    %25 = vector.shape_cast %24 : vector<1x4x32xf32> to vector<4x32xf32>
    %cst_21 = arith.constant dense<0.000000e+00> : vector<8x32xf32>
    %26 = tpu.matmul %23, %25, %cst_21 {dimension_numbers = #tpu.dot_dimension_numbers<[1], [0], [0], [1], [0, 0, 1, 1], [], []>} : vector<8x4xf32>, vector<4x32xf32>, vector<8x32xf32> -> vector<8x32xf32>
    %27 = arith.addf %22, %26 : vector<8x32xf32>
    %28 = vector.extract_strided_slice %3 {offsets = [0, 0], sizes = [8, 4], strides = [1, 1]} : vector<10x4xf32> to vector<8x4xf32>
    %c0_22 = arith.constant 0 : index
    %c0_23 = arith.constant 0 : index
    %c0_24 = arith.constant 0 : index
    %29 = vector.load %arg2[%c0_22, %c0_23, %c0_24] : memref<5x4x32xf32, #tpu.memory_space<vmem>>, vector<1x4x32xf32>
    %30 = vector.shape_cast %29 : vector<1x4x32xf32> to vector<4x32xf32>
    %cst_25 = arith.constant dense<0.000000e+00> : vector<8x32xf32>
    %31 = tpu.matmul %28, %30, %cst_25 {dimension_numbers = #tpu.dot_dimension_numbers<[1], [0], [0], [1], [0, 0, 1, 1], [], []>} : vector<8x4xf32>, vector<4x32xf32>, vector<8x32xf32> -> vector<8x32xf32>
    %32 = vector.extract_strided_slice %1 {offsets = [1, 0], sizes = [8, 4], strides = [1, 1]} : vector<10x4xf32> to vector<8x4xf32>
    %c1_26 = arith.constant 1 : index
    %c0_27 = arith.constant 0 : index
    %c0_28 = arith.constant 0 : index
    %33 = vector.load %arg2[%c1_26, %c0_27, %c0_28] : memref<5x4x32xf32, #tpu.memory_space<vmem>>, vector<1x4x32xf32>
    %34 = vector.shape_cast %33 : vector<1x4x32xf32> to vector<4x32xf32>
    %cst_29 = arith.constant dense<0.000000e+00> : vector<8x32xf32>
    %35 = tpu.matmul %32, %34, %cst_29 {dimension_numbers = #tpu.dot_dimension_numbers<[1], [0], [0], [1], [0, 0, 1, 1], [], []>} : vector<8x4xf32>, vector<4x32xf32>, vector<8x32xf32> -> vector<8x32xf32>
    %36 = arith.addf %31, %35 : vector<8x32xf32>
    %37 = vector.extract_strided_slice %3 {offsets = [1, 0], sizes = [8, 4], strides = [1, 1]} : vector<10x4xf32> to vector<8x4xf32>
    %c2_30 = arith.constant 2 : index
    %c0_31 = arith.constant 0 : index
    %c0_32 = arith.constant 0 : index
    %38 = vector.load %arg2[%c2_30, %c0_31, %c0_32] : memref<5x4x32xf32, #tpu.memory_space<vmem>>, vector<1x4x32xf32>
    %39 = vector.shape_cast %38 : vector<1x4x32xf32> to vector<4x32xf32>
    %cst_33 = arith.constant dense<0.000000e+00> : vector<8x32xf32>
    %40 = tpu.matmul %37, %39, %cst_33 {dimension_numbers = #tpu.dot_dimension_numbers<[1], [0], [0], [1], [0, 0, 1, 1], [], []>} : vector<8x4xf32>, vector<4x32xf32>, vector<8x32xf32> -> vector<8x32xf32>
    %41 = arith.addf %36, %40 : vector<8x32xf32>
    %42 = vector.extract_strided_slice %1 {offsets = [2, 0], sizes = [8, 4], strides = [1, 1]} : vector<10x4xf32> to vector<8x4xf32>
    %c3_34 = arith.constant 3 : index
    %c0_35 = arith.constant 0 : index
    %c0_36 = arith.constant 0 : index
    %43 = vector.load %arg2[%c3_34, %c0_35, %c0_36] : memref<5x4x32xf32, #tpu.memory_space<vmem>>, vector<1x4x32xf32>
    %44 = vector.shape_cast %43 : vector<1x4x32xf32> to vector<4x32xf32>
    %cst_37 = arith.constant dense<0.000000e+00> : vector<8x32xf32>
    %45 = tpu.matmul %42, %44, %cst_37 {dimension_numbers = #tpu.dot_dimension_numbers<[1], [0], [0], [1], [0, 0, 1, 1], [], []>} : vector<8x4xf32>, vector<4x32xf32>, vector<8x32xf32> -> vector<8x32xf32>
    %46 = arith.addf %41, %45 : vector<8x32xf32>
    %47 = vector.extract_strided_slice %3 {offsets = [2, 0], sizes = [8, 4], strides = [1, 1]} : vector<10x4xf32> to vector<8x4xf32>
    %c4_38 = arith.constant 4 : index
    %c0_39 = arith.constant 0 : index
    %c0_40 = arith.constant 0 : index
    %48 = vector.load %arg2[%c4_38, %c0_39, %c0_40] : memref<5x4x32xf32, #tpu.memory_space<vmem>>, vector<1x4x32xf32>
    %49 = vector.shape_cast %48 : vector<1x4x32xf32> to vector<4x32xf32>
    %cst_41 = arith.constant dense<0.000000e+00> : vector<8x32xf32>
    %50 = tpu.matmul %47, %49, %cst_41 {dimension_numbers = #tpu.dot_dimension_numbers<[1], [0], [0], [1], [0, 0, 1, 1], [], []>} : vector<8x4xf32>, vector<4x32xf32>, vector<8x32xf32> -> vector<8x32xf32>
    %51 = arith.addf %46, %50 : vector<8x32xf32>
    %52 = arith.maximumf %27, %51 : vector<8x32xf32>
    %c0_42 = arith.constant 0 : index
    %c0_43 = arith.constant 0 : index
    %53 = vector.load %arg3[%c0_42, %c0_43] : memref<1x32xf32, #tpu.memory_space<vmem>>, vector<1x32xf32>
    %54 = vector.broadcast %53 : vector<1x32xf32> to vector<8x32xf32>
    %55 = arith.addf %52, %54 : vector<8x32xf32>
    %cst_44 = arith.constant 0.000000e+00 : f32
    %56 = vector.broadcast %cst_44 : f32 to vector<8x32xf32>
    %57 = arith.maximumf %55, %56 : vector<8x32xf32>
    %cst_45 = arith.constant 0.000000e+00 : f32
    %58 = vector.broadcast %cst_45 : f32 to vector<1x32xf32>
    %c0_46 = arith.constant 0 : index
    %c0_47 = arith.constant 0 : index
    %59 = vector.load %arg7[%c0_46, %c0_47] : memref<10x32xf32, #tpu.memory_space<vmem>>, vector<1x32xf32>
    tpu.vector_store %arg7[%c0_46, %c0_47], %58 {strides = array<i32>} : memref<10x32xf32, #tpu.memory_space<vmem>>, vector<1x32xf32>,
    %c9 = arith.constant 9 : index
    %c0_48 = arith.constant 0 : index
    %60 = vector.load %arg7[%c9, %c0_48] : memref<10x32xf32, #tpu.memory_space<vmem>>, vector<1x32xf32>
    tpu.vector_store %arg7[%c9, %c0_48], %58 {strides = array<i32>} : memref<10x32xf32, #tpu.memory_space<vmem>>, vector<1x32xf32>,
    %c1_49 = arith.constant 1 : index
    %c0_50 = arith.constant 0 : index
    %61 = vector.load %arg7[%c1_49, %c0_50] : memref<10x32xf32, #tpu.memory_space<vmem>>, vector<8x32xf32>
    tpu.vector_store %arg7[%c1_49, %c0_50], %57 {strides = array<i32>} : memref<10x32xf32, #tpu.memory_space<vmem>>, vector<8x32xf32>,
    %c0_51 = arith.constant 0 : index
    %c0_52 = arith.constant 0 : index
    %62 = vector.load %arg7[%c0_51, %c0_52] : memref<10x32xf32, #tpu.memory_space<vmem>>, vector<8x32xf32>
    %c0_53 = arith.constant 0 : index
    %c0_54 = arith.constant 0 : index
    %c0_55 = arith.constant 0 : index
    %63 = vector.load %arg4[%c0_53, %c0_54, %c0_55] : memref<3x32x128xf32, #tpu.memory_space<vmem>>, vector<1x32x128xf32>
    %64 = vector.shape_cast %63 : vector<1x32x128xf32> to vector<32x128xf32>
    %cst_56 = arith.constant dense<0.000000e+00> : vector<8x128xf32>
    %65 = tpu.matmul %62, %64, %cst_56 {dimension_numbers = #tpu.dot_dimension_numbers<[1], [0], [0], [1], [0, 0, 1, 1], [], []>} : vector<8x32xf32>, vector<32x128xf32>, vector<8x128xf32> -> vector<8x128xf32>
    %c1_57 = arith.constant 1 : index
    %c0_58 = arith.constant 0 : index
    %66 = vector.load %arg7[%c1_57, %c0_58] : memref<10x32xf32, #tpu.memory_space<vmem>>, vector<8x32xf32>
    %c1_59 = arith.constant 1 : index
    %c0_60 = arith.constant 0 : index
    %c0_61 = arith.constant 0 : index
    %67 = vector.load %arg4[%c1_59, %c0_60, %c0_61] : memref<3x32x128xf32, #tpu.memory_space<vmem>>, vector<1x32x128xf32>
    %68 = vector.shape_cast %67 : vector<1x32x128xf32> to vector<32x128xf32>
    %cst_62 = arith.constant dense<0.000000e+00> : vector<8x128xf32>
    %69 = tpu.matmul %66, %68, %cst_62 {dimension_numbers = #tpu.dot_dimension_numbers<[1], [0], [0], [1], [0, 0, 1, 1], [], []>} : vector<8x32xf32>, vector<32x128xf32>, vector<8x128xf32> -> vector<8x128xf32>
    %70 = arith.addf %65, %69 : vector<8x128xf32>
    %c2_63 = arith.constant 2 : index
    %c0_64 = arith.constant 0 : index
    %71 = vector.load %arg7[%c2_63, %c0_64] : memref<10x32xf32, #tpu.memory_space<vmem>>, vector<8x32xf32>
    %c2_65 = arith.constant 2 : index
    %c0_66 = arith.constant 0 : index
    %c0_67 = arith.constant 0 : index
    %72 = vector.load %arg4[%c2_65, %c0_66, %c0_67] : memref<3x32x128xf32, #tpu.memory_space<vmem>>, vector<1x32x128xf32>
    %73 = vector.shape_cast %72 : vector<1x32x128xf32> to vector<32x128xf32>
    %cst_68 = arith.constant dense<0.000000e+00> : vector<8x128xf32>
    %74 = tpu.matmul %71, %73, %cst_68 {dimension_numbers = #tpu.dot_dimension_numbers<[1], [0], [0], [1], [0, 0, 1, 1], [], []>} : vector<8x32xf32>, vector<32x128xf32>, vector<8x128xf32> -> vector<8x128xf32>
    %75 = arith.addf %70, %74 : vector<8x128xf32>
    %c0_69 = arith.constant 0 : index
    %c0_70 = arith.constant 0 : index
    %76 = vector.load %arg5[%c0_69, %c0_70] : memref<1x128xf32, #tpu.memory_space<vmem>>, vector<1x128xf32>
    %77 = vector.broadcast %76 : vector<1x128xf32> to vector<8x128xf32>
    %78 = arith.addf %75, %77 : vector<8x128xf32>
    %cst_71 = arith.constant 0.000000e+00 : f32
    %79 = vector.broadcast %cst_71 : f32 to vector<8x128xf32>
    %80 = arith.maximumf %78, %79 : vector<8x128xf32>
    %c0_72 = arith.constant 0 : index
    %c0_73 = arith.constant 0 : index
    %c0_74 = arith.constant 0 : index
    %81 = vector.load %arg6[%c0_72, %c0_73, %c0_74] : memref<1x8x128xf32, #tpu.memory_space<vmem>>, vector<1x8x128xf32>
    %82 = vector.shape_cast %81 : vector<1x8x128xf32> to vector<8x128xf32>
    %83 = vector.shape_cast %80 : vector<8x128xf32> to vector<1x8x128xf32>
    tpu.vector_store %arg6[%c0_72, %c0_73, %c0_74], %83 {strides = array<i32>} : memref<1x8x128xf32, #tpu.memory_space<vmem>>, vector<1x8x128xf32>,
    return
  }
  func.func @transform_0(%arg0: i32) -> (i32, i32, i32, i32) {
    %c0_i32 = arith.constant 0 : i32
    %c0_i32_0 = arith.constant 0 : i32
    %c0_i32_1 = arith.constant 0 : i32
    %c0_i32_2 = arith.constant 0 : i32
    return %arg0, %c0_i32, %c0_i32_0, %c0_i32_1 : i32, i32, i32, i32
  }
  func.func @transform_1(%arg0: i32) -> (i32, i32, i32) {
    %c0_i32 = arith.constant 0 : i32
    %c0_i32_0 = arith.constant 0 : i32
    %c0_i32_1 = arith.constant 0 : i32
    %c0_i32_2 = arith.constant 0 : i32
    return %c0_i32, %c0_i32_0, %c0_i32_1 : i32, i32, i32
  }
  func.func @transform_2(%arg0: i32) -> (i32, i32) {
    %c0_i32 = arith.constant 0 : i32
    %c0_i32_0 = arith.constant 0 : i32
    %c0_i32_1 = arith.constant 0 : i32
    return %c0_i32, %c0_i32_0 : i32, i32
  }
  func.func @transform_3(%arg0: i32) -> (i32, i32, i32) {
    %c0_i32 = arith.constant 0 : i32
    %c0_i32_0 = arith.constant 0 : i32
    %c0_i32_1 = arith.constant 0 : i32
    %c0_i32_2 = arith.constant 0 : i32
    return %c0_i32, %c0_i32_0, %c0_i32_1 : i32, i32, i32
  }
  func.func @transform_4(%arg0: i32) -> (i32, i32) {
    %c0_i32 = arith.constant 0 : i32
    %c0_i32_0 = arith.constant 0 : i32
    %c0_i32_1 = arith.constant 0 : i32
    return %c0_i32, %c0_i32_0 : i32, i32
  }
  func.func @transform_5(%arg0: i32) -> (i32, i32, i32) {
    %c0_i32 = arith.constant 0 : i32
    %c0_i32_0 = arith.constant 0 : i32
    %c0_i32_1 = arith.constant 0 : i32
    return %arg0, %c0_i32, %c0_i32_0 : i32, i32, i32
  }
}

</mosaic_0001>

<bundles_post_ra>
// kernel: tpu_custom_call.1
= control target key start
LH: loop header
LB: loop body
LE: loop exit
PB: predicated region body
PF: predicated region fallthrough
CT: control target
= control target key end

     0   :  { %10 = vsyncpa [#allocation4], 0  ;;  %s1901_s0 = inlined_call_operand.vmem [shape: f32[2,2,10,4], index: 0, kind: input, shape index: {}]   ;;  %s1902_s1 = inlined_call_operand.vmem [shape: f32[5,4,32], index: 1, kind: input, shape index: {}]   ;;  %s1903_s2 = inlined_call_operand.vmem [shape: f32[1,32], index: 2, kind: input, shape index: {}]   ;;  %s1904_s3 = inlined_call_operand.hbm [shape: f32[3,32,128], index: 3, kind: input, shape index: {}]   ;;  %s1905_s4 = inlined_call_operand.vmem [shape: f32[1,128], index: 4, kind: input, shape index: {}]   ;;  %s1906_s5 = inlined_call_operand.hbm [shape: f32[2,8,128], index: 5, kind: output, shape index: {}]  }
   0x1   :  { %11 = vsyncpa [#allocation5], 0 }
   0x2   :  { %13 = vsyncpa [#allocation5 + $0x1], 0  ;;  %s1697_s18 = smov 0   ;;  %s1699_s19 = smov 0  }
   0x3   :  { %s1701_s20 = smov 0   ;;  %s1703_s21 = smov 0  }
   0x4 LB: > { %s1718_s22 = sadd.s32 4294967295, %s1659_s21   ;;  %s1352_s23 = sadd.s32 4294967294, %s1659_s21   ;;  %s1659_s21 = sphi %s1703_s21, %s1914_s21   ;;  %s1655_s20 = sphi %s1701_s20, %s1913_s20   ;;  %s1651_s19 = sphi %s1699_s19, %s1912_s19   ;;  %s1647_s18 = sphi %s1697_s18, %s1911_s18  }
   0x5   : > { %s1722_s24 = sadd.s32 1, %s1659_s21   ;;  %s136_s25 = sadd.s32 1, %s1655_s20 }
   0x6   : > { %s133_s26 = ssub.s32 %s1659_s21, %s1722_s24  ;;  %p146_p0 = scmp.ne.s32.totalorder %s1655_s20, %s1651_s19 }
   0x7   : > { %p134_p1 = scmp.eq.s32.totalorder %s133_s26, 0  ;;  %p147_p2 = scmp.eq.s32.totalorder %s1718_s22, 1 }
   0x8   : > { %p152_p3 = scmp.ne.s32.totalorder %s1651_s19, %s1647_s18  ;;  %p153_p4 = scmp.eq.s32.totalorder %s1352_s23, 1 }
   0x9   : > { %s1733_s27 = scalar_select %p134_p1, %s1655_s20, %s136_s25  }
   0xa   : > { %p1735_p5 = por %p147_p2, %p146_p0  ;;  %p1739_p6 = por %p153_p4, %p152_p3 }
   0xb   : > { %p1353_p7 = scmp.ge.s32.totalorder %s1659_s21, 1  ;;  %p160_p8 = scmp.lt.s32.totalorder %s1659_s21, 3 }
   0xc   : > { %s1908_s29 = scalar_select %p1739_p6, 1, 0 }
   0xd   : > { %p1529_p9 = scmp.eq.s32.totalorder %s1718_s22, 0  ;;  %p1746_p10 = pnand %p1353_p7, %p160_p8 }
   0xe   : > { %s1661_s6 = smov [#allocation3]  }
   0xf   : > { %s178_s7 = sshll.u32 %s1661_s6, 4  ;;  %p1521_p11 = pneg %p1746_p10  ;;  %s179_s7 = int_to_ptr.vmem [resolvable:$true] %s178_s7 }
  0x10   : > { %s1580_s8 = scalar_lea.vmem %s179_s7, 1536  ;;  %p1588_p3 = scmp.lt.s32.totalorder %s179_s7, %s179_s7 }
  0x11   : > { %p1522_p12 = pnand %p1529_p9, %p1521_p11  ;;  %p1581_p0 = scmp.ne.s32.totalorder %s179_s7, %s1580_s8 }
  0x12   : > { %p1589_p4 = scmp.lt.s32.totalorder %s1580_s8, %s1580_s8 }
  0x13   : > { %p1571_p13 = pneg %p1522_p12 }
  0x14   : > { %p1590_p6 = por %p1589_p4, %p1588_p3 }
  0x15   : > { %p1583_p1 = pnand %p1581_p0, %p1571_p13 }
  0x17   : > { %p1584_p2 = pneg %p1583_p1 }
  0x19   : > { %p1591_p7 = pnand %p1590_p6, %p1584_p2 }
  0x1b   : > { %1594 = shalt.err (!%p1591_p7)
}
  0x1c   : > { %s1662_s9 = smov 128   ;;  %s1663_s10 = smov 8  }
  0x1d   : > { %1524 = dma.hbm_to_vmem [thread:$0]  (!%p1522_p12), %s1904_s3, 1536, %s179_s7, [#allocation4], %s1662_s9, %s1662_s9, %s1663_s10  }
  0x1e   : > { %205 = sbr.rel (%p1746_p10) target bundleno = 492 (0x1ec), region = 40 }
  0x23   : > { %1638 = dma.done.wait (%p1529_p9), [#allocation4], 1536  }
  0x24   : > { %1640 = vsyncadd (%p1529_p9), [#allocation4], 4294965760  ;;  %p233_p8 = scmp.lt.s32.totalorder %s1718_s22, 1  ;;  %v1664_v0 = vmov 0.0   ;;  %vm1665_vm0 = vmmov 0   ;;  %vm250_vm1 = vcmask 1043456  }
  0x25   : > { %1432 = vmatprep.subr.mxu1 %v1664_v0  ;;  %1434 = vmatprep.mubr.msk.f32.mxu1 %vm1665_vm0, %v1664_v0  ;;  %vm246_vm2 = vcmask 31744   ;;  %v1363_v1 = vld [vmem:[%s1902_s1 + $0x4] sm:$0xf]  ;;  %v243_v3 = vld [vmem:[%s1902_s1] sm:$0xf]  ;;  %vm403_vm3 = vcmask 1046528  }
  0x26   : > { %s234_s13 = scalar_select %p233_p8, %s1718_s22, 1  ;;  %1442 = vmatprep.subr.mxu0 %v1664_v0  ;;  %1444 = vmatprep.mubr.msk.f32.mxu0 %vm1665_vm0, %v1664_v0  ;;  %v1368_v5 = vld [vmem:[%s1902_s1 + $0x8] sm:$0xf]  ;;  %v1371_v13 = vld [vmem:[%s1902_s1 + $0xc] sm:$0xf]  ;;  %vm567_vm4 = vcmask 1045504  }
  0x27   : > { %1433 = vmatpush3.msk.msra.mxu1 %vm250_vm1, %v1363_v1  ;;  %1443 = vmatpush3.msk.msra.mxu0 %vm250_vm1, %v1368_v5  ;;  %v1374_v16 = vld [vmem:[%s1902_s1 + $0x10] sm:$0xf]  ;;  %v1030_v22 = vld [vmem:[#allocation3 + $0x38] sm:$0xff]  ;;  %v1029_v24 = vld [vmem:[#allocation3 + $0x30] sm:$0xff]  ;;  %vm1015_vm5 = vcmask 253952   ;;  %vm1018_vm6 = vcmask 261120  }
  0x28   : > { %s1396_s14 = sshll.u32 %s234_s13, 5  ;;  %1437 = vmatprep.subr.mxu1 %v1664_v0  ;;  %1452 = vmatprep.subr.mxu0 %v1664_v0  ;;  %v1024_v23 = vld [vmem:[#allocation3 + $0x18] sm:$0xff]  ;;  %v1023_v25 = vld [vmem:[#allocation3 + $0x10] sm:$0xff]  ;;  %v1028_v26 = vld [vmem:[#allocation3 + $0x28] sm:$0xff]  ;;  %1016 = vst.msk [vmem:[#allocation2] sm:$0x1] %vm1015_vm5, %v1664_v0 }
  0x29   : > { %s237_s17 = scalar_lea.vmem %s1901_s0, %s1396_s14  ;;  %v1022_v27 = vld [vmem:[#allocation3 + $0x8] sm:$0xff]  ;;  %1017 = vst.msk [vmem:[#allocation2 + $0x9] sm:$0x1] %vm1015_vm5, %v1664_v0  ;;  %v1027_v28 = vld [vmem:[#allocation3 + $0x20] sm:$0xff]  ;;  %v1387_v57 = vld [vmem:[%s1903_s2] ss:$0 sm:$0xff] }
  0x2a   : > { %v1361_v2 = vld [vmem:[%s237_s17 + $0x10] sm:$0xff]  ;;  %v238_v4 = vld [vmem:[%s237_s17] sm:$0xff]  ;;  %v239_v6 = vld [vmem:[%s237_s17 + $0x8] sm:$0x3]  ;;  %s230_s14 = sand.u32 1, %s1651_s19   ;;  %s1393_s23 = sshll.u32 %s1718_s22, 7 }
  0x2b   : > { %1435 = vmatmul.mubr.msk.f32.vlgmr.msra.gmra.mxu1 %vm246_vm2, %v1361_v2  ;;  %v404_v7 = vrot.slane %v238_v4, 1  ;;  %v486_v8 = vrot.slane %v1361_v2, 1  ;;  %v568_v9 = vrot.slane %v238_v4, 2  ;;  %v405_v10 = vrot.slane %v239_v6, 1  ;;  %v1362_v12 = vld [vmem:[%s237_s17 + $0x18] sm:$0x3]  ;;  %s1279_s7 = scalar_lea.hbm %s1906_s5, %s1393_s23 }
  0x2c   : > { %1438 = vmatpush3.msk.msra.mxu1 %vm250_vm1, %v243_v3  ;;  %1439 = vmatprep.mubr.msk.f32.mxu1 %vm1665_vm0, %v1664_v0  ;;  %v569_v11 = vrot.slane %v239_v6, 2  ;;  %v487_v14 = vrot.slane %v1362_v12, 1  ;;  %v929_v19 = vrot.slane %v1361_v2, 2  ;;  %v930_v20 = vrot.slane %v1362_v12, 2  ;;  %v1021_v29 = vld [vmem:[#allocation3] sm:$0xff]  ;;  %v1182_v62 = vld [vmem:[#allocation3 + $0x58] sm:$0xff] }
  0x2d   : > { %1447 = vmatprep.subr.mxu1 %v1664_v0  ;;  %v406_v15 = vsel %vm403_vm3, %v404_v7, %v405_v10  ;;  %s1358_s15 = sshll.u32 %s230_s14, 3  ;;  %v1391_v12 = vld [vmem:[%s1905_s4] ss:$0 sm:$0xff]  ;;  %s1268_s8 = scalar_lea.sflag [#allocation5], %s230_s14 }
  0x2e   : > { %1445 = vmatmul.mubr.msk.f32.vlgmr.msra.gmra.mxu0 %vm246_vm2, %v406_v15  ;;  %v488_v17 = vsel %vm403_vm3, %v486_v8, %v487_v14  ;;  %v570_v18 = vsel %vm567_vm4, %v568_v9, %v569_v11  ;;  %v931_v21 = vsel %vm567_vm4, %v929_v19, %v930_v20  ;;  %s232_s25 = scalar_lea.vmem [#allocation6], %s1358_s15  ;;  %s1666_s10 = smov [#allocation6]  }
  0x2f   : > { %1440 = vmatmul.mubr.msk.f32.vlgmr.msra.gmra.mxu1 %vm246_vm2, %v238_v4  ;;  %1453 = vmatpush3.msk.msra.mxu0 %vm250_vm1, %v1374_v16  ;;  %v1179_v4 = vld [vmem:[#allocation3 + $0x40] sm:$0xff]  ;;  %s1281_s26 = sshll.u32 %s232_s25, 4  ;;  %s1599_s11 = sshll.u32 %s1666_s10, 4  ;;  %s1282_s26 = int_to_ptr.vmem [resolvable:$true] %s1281_s26  ;;  %s1600_s11 = int_to_ptr.vmem [resolvable:$false] %s1599_s11 }
  0x30   : > { %1448 = vmatpush3.msk.msra.mxu1 %vm250_vm1, %v1371_v13  ;;  %1449 = vmatprep.mubr.msk.f32.mxu1 %vm1665_vm0, %v1664_v0  ;;  %s1595_s9 = scalar_lea.vmem %s1282_s26, 128  ;;  %s1601_s22 = scalar_lea.vmem %s1600_s11, 256 }
  0x31   : > { %1454 = vmatprep.mubr.msk.f32.mxu0 %vm1665_vm0, %v1664_v0  ;;  %1457 = vmatprep.subr.mxu1 %v1664_v0  ;;  %p1596_p6 = scmp.ne.s32.totalorder %s1282_s26, %s1595_s9  ;;  %p1602_p11 = scmp.lt.s32.totalorder %s1282_s26, %s1600_s11 }
  0x32   : > { %1462 = vmatprep.subr.mxu0 %v1664_v0  ;;  %1455 = vmatmul.mubr.msk.f32.vlgmr.msra.gmra.mxu0 %vm246_vm2, %v570_v18  ;;  %p1603_p12 = scmp.lt.s32.totalorder %s1601_s22, %s1595_s9 }
  0x33   : > { %1450 = vmatmul.mubr.msk.f32.vlgmr.msra.gmra.mxu1 %vm246_vm2, %v488_v17  ;;  %1463 = vmatpush3.msk.msra.mxu0 %vm250_vm1, %v243_v3  ;;  %v1180_v3 = vld [vmem:[#allocation3 + $0x48] sm:$0xff]  ;;  %p1597_p9 = pnand %p1596_p6, %p1735_p5 }
  0x34   : > { %1458 = vmatpush3.msk.msra.mxu1 %vm250_vm1, %v1363_v1  ;;  %1459 = vmatprep.mubr.msk.f32.mxu1 %vm1665_vm0, %v1664_v0  ;;  %p1604_p13 = por %p1603_p12, %p1602_p11 }
  0x35   : > { %1464 = vmatprep.mubr.msk.f32.mxu0 %vm1665_vm0, %v1664_v0  ;;  %1467 = vmatprep.subr.mxu1 %v1664_v0  ;;  %p1598_p10 = pneg %p1597_p9 }
  0x36   : > { %1472 = vmatprep.subr.mxu0 %v1664_v0  ;;  %1465 = vmatmul.mubr.msk.f32.vlgmr.msra.gmra.mxu0 %vm246_vm2, %v1361_v2  ;;  %v1181_v2 = vld [vmem:[#allocation3 + $0x50] sm:$0xff] }
  0x37   : > { %1460 = vmatmul.mubr.msk.f32.vlgmr.msra.gmra.mxu1 %vm246_vm2, %v406_v15  ;;  %1473 = vmatpush3.msk.msra.mxu0 %vm250_vm1, %v1371_v13  ;;  %p1605_p0 = pnand %p1604_p13, %p1598_p10 }
  0x38   : > { %1468 = vmatpush3.msk.msra.mxu1 %vm250_vm1, %v1368_v5  ;;  %1469 = vmatprep.mubr.msk.f32.mxu1 %vm1665_vm0, %v1664_v0 }
  0x39   : > { %1474 = vmatprep.mubr.msk.f32.mxu0 %vm1665_vm0, %v1664_v0  ;;  %1477 = vmatprep.subr.mxu1 %v1664_v0 }
  0x3a   : > { %1482 = vmatprep.subr.mxu0 %v1664_v0  ;;  %1475 = vmatmul.mubr.msk.f32.vlgmr.msra.gmra.mxu0 %vm246_vm2, %v570_v18 }
  0x3b   : > { %1470 = vmatmul.mubr.msk.f32.vlgmr.msra.gmra.mxu1 %vm246_vm2, %v488_v17  ;;  %1490 = vmatprep.mubr.msk.f32.mxu0 %vm1665_vm0, %v1664_v0 }
  0x3c   : > { %1478 = vmatpush3.msk.msra.mxu1 %vm250_vm1, %v1374_v16  ;;  %1479 = vmatprep.mubr.msk.f32.mxu1 %vm1665_vm0, %v1664_v0 }
  0x3d   : > { %1493 = vmatprep.subr.mxu1 %v1664_v0  ;;  %1483 = vmatpush3.msra.mxu0 %v1030_v22 }
  0x3e   : > { %1484 = vmatprep.subr.mxu0 %v1664_v0 }
  0x3f   : > { %1480 = vmatmul.mubr.msk.f32.vlgmr.msra.gmra.mxu1 %vm246_vm2, %v931_v21  ;;  %1485 = vmatpush3.msra.mxu0 %v1029_v24 }
  0x40   : > { %1501 = vmatprep.mubr.msk.f32.mxu1 %vm1665_vm0, %v1664_v0  ;;  %1494 = vmatpush3.msra.mxu1 %v1024_v23 }
  0x41   : > { %1495 = vmatprep.subr.mxu1 %v1664_v0  ;;  %1486 = vmatprep.subr.mxu0 %v1664_v0 }
  0x42   : > { %1496 = vmatpush3.msra.mxu1 %v1023_v25  ;;  %1487 = vmatpush3.msra.mxu0 %v1028_v26 }
  0x43   : > { %1497 = vmatprep.subr.mxu1 %v1664_v0  ;;  %1488 = vmatprep.subr.mxu0 %v1664_v0 }
  0x44   : > { %1498 = vmatpush3.msra.mxu1 %v1022_v27  ;;  %1489 = vmatpush3.msra.mxu0 %v1027_v28 }
  0x45   : > { %1499 = vmatprep.subr.mxu1 %v1664_v0  ;;  %1504 = vmatprep.subr.mxu0 %v1664_v0 }
  0x46   : > { %1500 = vmatpush3.msra.mxu1 %v1021_v29 }
  0xeb   : > { %v320_v30 = vpop.f32.mrf.mxu1 }
  0xed   : > { %v1436_v31 = vpop.f32.mrf.mxu1 }
  0xee   : > { %v478_v33 = vpop.f32.mrf.mxu0 }
  0xef   : > { %v396_v32 = vpop.f32.mrf.mxu1 }
  0xf0   : > { %v1446_v35 = vpop.f32.mrf.mxu0  ;;  %v397_v38 = vadd.f32 %v396_v32, %v320_v30 }
  0xf1   : > { %v1441_v34 = vpop.f32.mrf.mxu1 }
  0xf2   : > { %v642_v37 = vpop.f32.mrf.mxu0  ;;  %v482_v43 = vadd.f32 %v478_v33, %v397_v38 }
  0xf3   : > { %v560_v36 = vpop.f32.mrf.mxu1 }
  0xf4   : > { %v1456_v40 = vpop.f32.mrf.mxu0  ;;  %v564_v49 = vadd.f32 %v560_v36, %v482_v43 }
  0xf5   : > { %v1451_v39 = vpop.f32.mrf.mxu1 }
  0xf6   : > { %v783_v42 = vpop.f32.mrf.mxu0  ;;  %v646_v55 = vadd.f32 %v642_v37, %v564_v49 }
  0xf7   : > { %v713_v41 = vpop.f32.mrf.mxu1 }
  0xf8   : > { %v1466_v45 = vpop.f32.mrf.mxu0  ;;  %v784_v46 = vadd.f32 %v783_v42, %v713_v41 }
  0xf9   : > { %v1461_v44 = vpop.f32.mrf.mxu1 }
  0xfa   : > { %v924_v48 = vpop.f32.mrf.mxu0 }
  0xfb   : > { %v853_v47 = vpop.f32.mrf.mxu1 }
  0xfc   : > { %v857_v50 = vadd.f32 %v853_v47, %v784_v46  ;;  %v1476_v52 = vpop.f32.mrf.mxu0 }
  0xfd   : > { %v1471_v51 = vpop.f32.mrf.mxu1 }
  0xfe   : > { %v928_v53 = vadd.f32 %v924_v48, %v857_v50 }
  0xff   : > { %v1000_v54 = vpop.f32.mrf.mxu1 }
 0x100   : > { %v1004_v56 = vadd.f32 %v1000_v54, %v928_v53 }
 0x101   : > { %v1481_v58 = vpop.f32.mrf.mxu1 }
 0x102   : > { %v1005_v59 = vmax.f32 %v646_v55, %v1004_v56 }
 0x104   : > { %v1013_v60 = vadd.f32 %v1387_v57, %v1005_v59 }
 0x106   : > { %v1014_v61 = vmax.f32 %v1013_v60, 0.0 }
 0x108   : > { %1019 = vst.msk [vmem:[#allocation2 + $0x1] sm:$0xff] %vm1018_vm6, %v1014_v61 }
 0x10f   : > { %v1025_v63 = vld [vmem:[#allocation2 + $0x1] sm:$0xff] }
 0x110   : > { %v1020_v1 = vld [vmem:[#allocation2] sm:$0xff]  ;;  %1491 = vmatmul.mubr.msk.f32.vlgmr.msra.gmra.mxu0 %vm1018_vm6, %v1025_v63 }
 0x111   : > { %1502 = vmatmul.mubr.msk.f32.vlgmr.msra.gmra.mxu1 %vm1018_vm6, %v1020_v1  ;;  %1505 = vmatpush3.msra.mxu0 %v1182_v62  ;;  %v1177_v5 = vld [vmem:[#allocation2 + $0x2] sm:$0xff] }
 0x112   : > { %1512 = vmatprep.mubr.msk.f32.mxu0 %vm1665_vm0, %v1664_v0  ;;  %1506 = vmatprep.subr.mxu0 %v1664_v0 }
 0x113   : > { %1507 = vmatpush3.msra.mxu0 %v1181_v2 }
 0x114   : > { %1508 = vmatprep.subr.mxu0 %v1664_v0 }
 0x115   : > { %1509 = vmatpush3.msra.mxu0 %v1180_v3 }
 0x116   : > { %1510 = vmatprep.subr.mxu0 %v1664_v0 }
 0x117   : > { %1511 = vmatpush3.msra.mxu0 %v1179_v4 }
 0x118   : > { %1513 = vmatmul.mubr.msk.f32.vlgmr.msra.gmra.mxu0 %vm1018_vm6, %v1177_v5 }
 0x1d0   : > { %v1100_v6 = vpop.f32.mrf.mxu0 }
 0x1d1   : > { %v1173_v7 = vpop.f32.mrf.mxu1 }
 0x1d2   : > { %v1492_v8 = vpop.f32.mrf.mxu0  ;;  %v1174_v10 = vadd.f32 %v1173_v7, %v1100_v6 }
 0x1d3   : > { %v1503_v9 = vpop.f32.mrf.mxu1 }
 0x1d8   : > { %v1252_v11 = vpop.f32.mrf.mxu0 }
 0x1d9   : > { %v1256_v13 = vadd.f32 %v1252_v11, %v1174_v10 }
 0x1da   : > { %v1514_v14 = vpop.f32.mrf.mxu0 }
 0x1db   : > { %v1264_v0 = vadd.f32 %v1391_v12, %v1256_v13 }
 0x1dd   : > { %v1265_v15 = vmax.f32 %v1264_v0, 0.0 }
 0x1df   : > { %1266 = vst [vmem:[%s232_s25] sm:$0xff] %v1265_v15 }
 0x1e0   : > { %1608 = shalt.err (!%p1605_p0)
}
 0x1e1   : > { %s1609_s12 = scalar_lea.hbm %s1279_s7, 128  ;;  %s1613_s15 = scalar_lea.hbm %s1906_s5, 256 }
 0x1e2   : > { %p1610_p1 = scmp.ne.s32.totalorder %s1279_s7, %s1609_s12  ;;  %p1614_p4 = scmp.lt.s32.totalorder %s1279_s7, %s1906_s5 }
 0x1e3   : > { %p1615_p7 = scmp.lt.s32.totalorder %s1613_s15, %s1609_s12 }
 0x1e4   : > { %p1611_p2 = pnand %p1610_p1, %p1735_p5 }
 0x1e5   : > { %p1616_p8 = por %p1615_p7, %p1614_p4 }
 0x1e6   : > { %p1612_p3 = pneg %p1611_p2 }
 0x1e8   : > { %p1617_p6 = pnand %p1616_p8, %p1612_p3 }
 0x1ea   : > { %1620 = shalt.err (!%p1617_p6)
}
 0x1eb   : > { %1519 = dma.vmem_to_hbm [thread:$0]  (%p1735_p5), %s1282_s26, 128, %s1279_s7, %s1268_s8  }
 0x1ec PF: > { %p1531_p9 = scmp.ge.s32.totalorder %s1659_s21, 2  ;;  %s1293_s23 = sand.u32 1, %s1647_s18  }
 0x1ed   : > { %p1910_p10 = scmp.ne.s32.totalorder %s1908_s29, 0  ;;  %s1294_s25 = scalar_lea.sflag [#allocation5], %s1293_s23 }
 0x1ef   : > { %p1526_p11 = pnand %p1531_p9, %p1910_p10 }
 0x1f1   : > { %p1527_p12 = pneg %p1526_p11 }
 0x1f3   : > { %1642 = dma.done.wait (%p1527_p12), %s1294_s25, 128  }
 0x1f4   : > { %1644 = vsyncadd (%p1527_p12), %s1294_s25, 4294967168  ;;  %p16_p13 = scmp.ge.s32.totalorder %s1722_s24, 4   ;;  %s1911_s18 = smov %s1651_s19 }
 0x1f5   : > { %s1912_s19 = smov %s1655_s20  ;;  %s1913_s20 = smov %s1733_s27 }
 0x1f6   : > { %s1914_s21 = smov %s1722_s24  ;;  %18 = sbr.rel (!%p16_p13) target bundleno = 4 (0x4), region = 87 }
 0x1fb   :  { %1299 = vsyncpa [#allocation4], 1 }
 0x1fc   :  { %1301 = vsyncpa [#allocation4 + $0x1], 1 }
 0x1fd   :  { %1302 = vsyncpa [#allocation5], 1 }
 0x1fe   :  { %1304 = vsyncpa [#allocation5 + $0x1], 1 }

</bundles_post_ra>
